<compile_context>
chip_gen: v6e
topology: v6e:2x2x1
jax: 0.10.0
libtpu: 0.0.40
codegen_flags: <defaults>
</compile_context>

<pallas_src>
import functools

import jax
import jax.numpy as jnp
from jax.experimental import pallas as pl
from jax.experimental.pallas import tpu as pltpu

_MiB = 1024 * 1024


def _map_loss_neg_kernel(pred_ref, tgt_ref, out_ref, *, normalize, scale,
                         batch, row_tile, mask_rows):
    pred = pred_ref[...].astype(jnp.float32)   # (TB, C)
    tgt = tgt_ref[...].astype(jnp.float32)     # (TB, C)

    if normalize:
        row_max = jnp.max(pred, axis=1, keepdims=True)            # (TB, 1)
        inv = 1.0 / (row_max + jnp.float32(1e-06))                # TB divides only
        pred = pred * inv                                         # broadcast mul (VPU)

    one_minus_tgt = 1.0 - tgt
    neg = pred * one_minus_tgt
    row_sum = jnp.sum(neg * neg, axis=1, keepdims=True)           # (TB, 1)

    if scale:
        factor = jnp.sum(one_minus_tgt, axis=1, keepdims=True)    # (TB, 1)
        row_sum = row_sum / factor                                # TB divides only

    if mask_rows:
        # Last tile may extend past B; zero the padded rows' contribution.
        row_ids = (pl.program_id(0) * row_tile
                   + jax.lax.broadcasted_iota(jnp.int32, row_sum.shape, 0))
        row_sum = jnp.where(row_ids < batch, row_sum, 0.0)

    # Partial sum for this tile; the wrapper divides by B for the mean.
    out_ref[0, 0] = jnp.sum(row_sum)


def _vmem_capacity_bytes():
    """Physical per-core VMEM; conservative v7x fallback if the query fails."""
    try:
        info = pltpu.get_tpu_info()
        cap = getattr(info, "vmem_capacity_bytes", None)
        if cap:
            return int(cap)
    except Exception:
        pass
    return 64 * _MiB


def _pick_row_tile(B, C, itemsize, budget):
    """Row tile sized by total VMEM footprint (pipeline buffers + temporaries)."""
    # 2 inputs x 2 pipeline buffers in the input dtype, plus ~4 full-tile f32
    # in-body temporaries (f32 upcasts, 1-target, neg, neg^2).
    per_row = 4 * C * itemsize + 4 * C * 4
    rows_cap = max(8, budget // per_row)

    # Don't shrink below ~4 MiB of HBM traffic per grid step (per-step
    # overhead ~0.35 us would otherwise dominate at small C).
    rows_floor = max(8, (4 * _MiB) // max(2 * C * itemsize, 1))
    # Aim for >= 8 grid steps when B allows (v7x megacore + pipeline ramp).
    rows_target = pl.cdiv(B, 8)

    tb = min(rows_cap, max(rows_target, rows_floor), B)
    if tb >= B:
        return B                      # single tile: block == full array dim (legal)
    tb = max(8, (tb // 8) * 8)        # multiple of 8 for the (8, 128) rule
    return min(tb, B)


def map_loss_l2_neg(onset_map_pred, onset_map, *, normalize=True, scale=True):
    """Pallas implementation of MapLossL2Neg.forward. Returns a scalar (shape ())."""
    assert onset_map_pred.shape == onset_map.shape
    B, C = onset_map_pred.shape

    itemsize = max(jnp.dtype(onset_map_pred.dtype).itemsize,
                   jnp.dtype(onset_map.dtype).itemsize)

    phys = _vmem_capacity_bytes()
    # Total-footprint budget: ~40 MiB on v7x (64 MiB VMEM), up to 64 MiB on
    # v5e/v6e (128 MiB VMEM); scoped limit gets extra headroom below physical.
    budget = min(max(phys - 24 * _MiB, 16 * _MiB), 64 * _MiB)
    vmem_limit = min(budget + 16 * _MiB, phys - 8 * _MiB)

    TB = _pick_row_tile(B, C, itemsize, budget)
    num_tiles = pl.cdiv(B, TB)
    mask_rows = (B % TB) != 0

    kernel = functools.partial(
        _map_loss_neg_kernel,
        normalize=normalize, scale=scale,
        batch=B, row_tile=TB, mask_rows=mask_rows,
    )

    partials = pl.pallas_call(
        kernel,
        out_shape=jax.ShapeDtypeStruct((num_tiles, 1), jnp.float32),
        grid_spec=pltpu.PrefetchScalarGridSpec(
            num_scalar_prefetch=0,
            grid=(num_tiles,),
            in_specs=[
                pl.BlockSpec((TB, C), lambda i: (i, 0)),
                pl.BlockSpec((TB, C), lambda i: (i, 0)),
            ],
            out_specs=pl.BlockSpec(
                (1, 1), lambda i: (i, 0), memory_space=pltpu.SMEM
            ),
        ),
        compiler_params=pltpu.CompilerParams(
            dimension_semantics=("parallel",),   # independent tiles -> megacore on v7x
            vmem_limit_bytes=int(vmem_limit),
        ),
    )(onset_map_pred, onset_map)

    return jnp.sum(partials) / jnp.float32(B)


def _reference(onset_map_pred, onset_map, normalize=True, scale=True):
    """Pure-JAX reference mirroring the PyTorch MapLossL2Neg module."""
    pred = onset_map_pred
    if normalize:
        maxes = jnp.max(pred, axis=1, keepdims=True)
        pred = pred / (maxes + 1e-06)
    neg = jnp.sum((pred * (1.0 - onset_map)) ** 2, axis=1)
    if scale:
        factor = jnp.sum(1.0 - onset_map, axis=1)
        neg = neg / factor
    return jnp.mean(neg)


if __name__ == "__main__":
    key = jax.random.PRNGKey(0)
    k1, k2 = jax.random.split(key)

    B, C = 16, 128  # small shapes; C is the "map" width, B the batch
    onset_map_pred = jax.random.uniform(k1, (B, C), dtype=jnp.float32)
    # Binary-ish target map (mostly zeros so the scale factor is > 0 per row).
    onset_map = (jax.random.uniform(k2, (B, C)) > 0.8).astype(jnp.float32)

    loss = jax.block_until_ready(map_loss_l2_neg(onset_map_pred, onset_map))
    ref = jax.block_until_ready(_reference(onset_map_pred, onset_map))
    assert jnp.allclose(loss, ref, rtol=1e-5, atol=1e-6), (loss, ref)

    # Extra ragged-batch check (B not a multiple of the tile / not divisible):
    B2, C2 = 37, 128
    k3, k4 = jax.random.split(k2)
    p2 = jax.random.uniform(k3, (B2, C2), dtype=jnp.float32)
    t2 = (jax.random.uniform(k4, (B2, C2)) > 0.8).astype(jnp.float32)
    loss2 = jax.block_until_ready(map_loss_l2_neg(p2, t2))
    ref2 = jax.block_until_ready(_reference(p2, t2))
    assert jnp.allclose(loss2, ref2, rtol=1e-5, atol=1e-6), (loss2, ref2)

    print("KERNEL_OK")
</pallas_src>

<mosaic_0001>
module attributes {stable_mosaic.version = 11 : i64} {
  func.func @_map_loss_neg_kernel(%arg0: i32, %arg1: memref<16x128xf32, #tpu.memory_space<vmem>>, %arg2: memref<16x128xf32, #tpu.memory_space<vmem>>, %arg3: memref<1x1xf32, #tpu.memory_space<smem>>) attributes {dimension_semantics = [#tpu.dimension_semantics<parallel>], iteration_bounds = array<i64: 1>, scalar_prefetch = 0 : i64, scratch_operands = 0 : i64, tpu.core_type = #tpu.core_type<tc>, window_params = [{transform_indices = @transform_0, window_bounds = array<i64: 16, 128>}, {transform_indices = @transform_1, window_bounds = array<i64: 16, 128>}, {transform_indices = @transform_2, window_bounds = array<i64: 1, 1>}]} {
    %c0 = arith.constant 0 : index
    %c0_0 = arith.constant 0 : index
    %0 = vector.load %arg1[%c0, %c0_0] : memref<16x128xf32, #tpu.memory_space<vmem>>, vector<16x128xf32>
    %c0_1 = arith.constant 0 : index
    %c0_2 = arith.constant 0 : index
    %1 = vector.load %arg2[%c0_1, %c0_2] : memref<16x128xf32, #tpu.memory_space<vmem>>, vector<16x128xf32>
    %cst = arith.constant dense<0xFF800000> : vector<16xf32>
    %2 = vector.multi_reduction <maximumf>, %0, %cst [1] : vector<16x128xf32> to vector<16xf32>
    %3 = vector.shape_cast %2 : vector<16xf32> to vector<16x1xf32>
    %cst_3 = arith.constant 9.99999997E-7 : f32
    %4 = vector.broadcast %cst_3 : f32 to vector<16x1xf32>
    %5 = arith.addf %3, %4 : vector<16x1xf32>
    %cst_4 = arith.constant 1.000000e+00 : f32
    %6 = vector.broadcast %cst_4 : f32 to vector<16x1xf32>
    %7 = arith.divf %6, %5 : vector<16x1xf32>
    %8 = vector.broadcast %7 : vector<16x1xf32> to vector<16x128xf32>
    %9 = arith.mulf %0, %8 : vector<16x128xf32>
    %cst_5 = arith.constant 1.000000e+00 : f32
    %10 = vector.broadcast %cst_5 : f32 to vector<16x128xf32>
    %11 = arith.subf %10, %1 : vector<16x128xf32>
    %12 = arith.mulf %9, %11 : vector<16x128xf32>
    %13 = arith.mulf %12, %12 : vector<16x128xf32>
    %cst_6 = arith.constant dense<0.000000e+00> : vector<16xf32>
    %14 = vector.multi_reduction <add>, %13, %cst_6 [1] : vector<16x128xf32> to vector<16xf32>
    %15 = vector.shape_cast %14 : vector<16xf32> to vector<16x1xf32>
    %cst_7 = arith.constant dense<0.000000e+00> : vector<16xf32>
    %16 = vector.multi_reduction <add>, %11, %cst_7 [1] : vector<16x128xf32> to vector<16xf32>
    %17 = vector.shape_cast %16 : vector<16xf32> to vector<16x1xf32>
    %18 = arith.divf %15, %17 : vector<16x1xf32>
    %19 = vector.shape_cast %18 : vector<16x1xf32> to vector<1x16x1xf32>
    %cst_8 = arith.constant dense<0.000000e+00> : vector<1xf32>
    %20 = vector.multi_reduction <add>, %19, %cst_8 [1, 2] : vector<1x16x1xf32> to vector<1xf32>
    %21 = vector.shape_cast %20 : vector<1xf32> to vector<1x1x1xf32>
    %22 = vector.extract %21[0, 0, 0] : f32 from vector<1x1x1xf32>
    %c0_9 = arith.constant 0 : index
    %c0_10 = arith.constant 0 : index
    %23 = memref.load %arg3[%c0_9, %c0_10] : memref<1x1xf32, #tpu.memory_space<smem>>
    memref.store %22, %arg3[%c0_9, %c0_10] : memref<1x1xf32, #tpu.memory_space<smem>>
    return
  }
  func.func @transform_0(%arg0: i32) -> (i32, i32) {
    %c0_i32 = arith.constant 0 : i32
    %c0_i32_0 = arith.constant 0 : i32
    return %arg0, %c0_i32 : i32, i32
  }
  func.func @transform_1(%arg0: i32) -> (i32, i32) {
    %c0_i32 = arith.constant 0 : i32
    %c0_i32_0 = arith.constant 0 : i32
    return %arg0, %c0_i32 : i32, i32
  }
  func.func @transform_2(%arg0: i32) -> (i32, i32) {
    %c0_i32 = arith.constant 0 : i32
    %c0_i32_0 = arith.constant 0 : i32
    return %arg0, %c0_i32 : i32, i32
  }
}

</mosaic_0001>

<bundles_post_ra>
// kernel: tpu_custom_call.1
= control target key start
LH: loop header
LB: loop body
LE: loop exit
PB: predicated region body
PF: predicated region fallthrough
CT: control target
= control target key end

     0   :  { %7 = vsyncpa [#allocation3], 0  ;;  %s202_s0 = inlined_call_operand.hbm [shape: f32[16,128], index: 0, kind: input, shape index: {}]   ;;  %s203_s1 = inlined_call_operand.hbm [shape: f32[16,128], index: 1, kind: input, shape index: {}]   ;;  %s204_s2 = inlined_call_operand.hbm [shape: f32[1,1], index: 2, kind: output, shape index: {}]  }
   0x1   :  { %8 = vsyncpa [#allocation6], 0 }
   0x2   :  { %9 = vsyncpa [#allocation4], 0  ;;  %s173_s9 = smov [#allocation2]  }
   0x3   :  { %s15_s10 = sshll.u32 %s173_s9, 4  ;;  %s16_s10 = int_to_ptr.vmem [resolvable:$true] %s15_s10 }
   0x4   :  { %s127_s11 = scalar_lea.vmem %s16_s10, 256  ;;  %p132_p1 = scmp.lt.s32.totalorder %s16_s10, %s16_s10 }
   0x5   :  { %p128_p0 = scmp.ne.s32.totalorder %s16_s10, %s127_s11  ;;  %p133_p2 = scmp.lt.s32.totalorder %s127_s11, %s127_s11 }
   0x7   :  { %p134_p3 = por %p133_p2, %p132_p1 }
   0x9   :  { %p135_p4 = pnand %p134_p3, %p128_p0 }
   0xb   :  { %138 = shalt.err (!%p135_p4)
}
   0xc   :  { %s174_s12 = smov 128   ;;  %s175_s13 = smov 8  }
   0xd   :  { %21 = dma.hbm_to_vmem [thread:$0]  %s202_s0, 256, %s16_s10, [#allocation3], %s174_s12, %s174_s12, %s175_s13  }
   0xe   :  { %s176_s16 = smov [#allocation5]  }
   0xf   :  { %s27_s17 = sshll.u32 %s176_s16, 4  ;;  %s28_s17 = int_to_ptr.vmem [resolvable:$true] %s27_s17 }
  0x10   :  { %s147_s18 = scalar_lea.vmem %s28_s17, 256  ;;  %p152_p6 = scmp.lt.s32.totalorder %s28_s17, %s28_s17 }
  0x11   :  { %p148_p5 = scmp.ne.s32.totalorder %s28_s17, %s147_s18  ;;  %p153_p7 = scmp.lt.s32.totalorder %s147_s18, %s147_s18 }
  0x13   :  { %p154_p8 = por %p153_p7, %p152_p6 }
  0x15   :  { %p155_p9 = pnand %p154_p8, %p148_p5 }
  0x17   :  { %158 = shalt.err (!%p155_p9)
}
  0x18   :  { %33 = dma.hbm_to_vmem [thread:$0]  %s203_s1, 256, %s28_s17, [#allocation6], %s174_s12, %s174_s12, %s175_s13  }
  0x19   :  { %167 = dma.done.wait [#allocation3], 256  }
  0x1a   :  { %168 = vsyncadd [#allocation3], 4294967040 }
  0x1b   :  { %169 = dma.done.wait [#allocation6], 256  }
  0x1c   :  { %170 = vsyncadd [#allocation6], 4294967040  ;;  %v40_v0 = vld [vmem:[#allocation2] sm:$0xff]  ;;  %v41_v1 = vld [vmem:[#allocation2 + $0x8] sm:$0xff]  ;;  %vm74_vm0 = vcmask 7168   ;;  %s177_s1 = smov [#allocation7]  }
  0x1d   :  { %44 = vmax.xlane.f32.xlu0 %v40_v0  ;;  %v42_v2 = vld [vmem:[#allocation5] sm:$0xff]  ;;  %v43_v4 = vld [vmem:[#allocation5 + $0x8] sm:$0xff] }
  0x1e   :  { %v56_v3 = vsub.f32 1.0, %v42_v2  ;;  %v57_v5 = vsub.f32 1.0, %v43_v4 }
  0x20   :  { %66 = vadd.xlane.f32.xlu1 %v56_v3 }
  0x21   :  { %46 = vmax.xlane.f32.xlu0 %v41_v1 }
  0x24   :  { %68 = vadd.xlane.f32.xlu1 %v57_v5 }
  0xa6   :  { %v45_v6 = vpop.xlane.xlu0 %44 }
  0xa7   :  { %v48_v7 = vadd.f32 1e-06, %v45_v6 }
  0xa9   :  { %111 = vrcp.f32 %v48_v7  ;;  %v67_v18 = vpop.xlane.xlu1 %66 }
  0xaa   :  { %v47_v8 = vpop.xlane.xlu0 %46 }
  0xab   :  { %v49_v9 = vadd.f32 1e-06, %v47_v8 }
  0xad   :  { %113 = vrcp.f32 %v49_v9  ;;  %v69_v19 = vpop.xlane.xlu1 %68 }
  0xae   :  { %115 = vrcp.f32 %v67_v18 }
  0xaf   :  { %117 = vrcp.f32 %v69_v19 }
  0xb6   :  { %v112_v10 = vpop.eup %111 }
  0xb7   :  { %v54_v11 = vmul.f32 %v112_v10, %v40_v0 }
  0xb9   :  { %v58_v12 = vmul.f32 %v56_v3, %v54_v11 }
  0xba   :  { %v114_v13 = vpop.eup %113 }
  0xbb   :  { %v60_v14 = vmul.f32 %v58_v12, %v58_v12  ;;  %v55_v15 = vmul.f32 %v114_v13, %v41_v1  ;;  %v116_v20 = vpop.eup %115 }
  0xbc   :  { %v118_v22 = vpop.eup %117 }
  0xbd   :  { %62 = vadd.xlane.f32.xlu0 %v60_v14  ;;  %v59_v16 = vmul.f32 %v57_v5, %v55_v15 }
  0xbf   :  { %v61_v17 = vmul.f32 %v59_v16, %v59_v16 }
  0xc1   :  { %64 = vadd.xlane.f32.xlu1 %v61_v17 }
 0x146   :  { %v63_v21 = vpop.xlane.xlu0 %62 }
 0x147   :  { %v71_v23 = vmul.f32 %v116_v20, %v63_v21 }
 0x149   :  { %v75_v26 = vsel %vm74_vm0, %v71_v23, 0.0 }
 0x14a   :  { %v65_v24 = vpop.xlane.xlu1 %64 }
 0x14b   :  { %v73_v25 = vmul.f32 %v118_v22, %v65_v24 }
 0x14d   :  { %v76_v27 = vsel %vm74_vm0, %v73_v25, 0.0 }
 0x14e   :  { %v77_v28 = vadd.f32 %v76_v27, %v75_v26 }
 0x150   :  { %78 = vadd.xlane.f32.xlu0 %v77_v28 }
 0x1d9   :  { %v79_v29 = vpop.xlane.xlu0 %78 }
 0x1da   :  { %v80_v30 = vrot.slane %v79_v29, 4 }
 0x1dc   :  { %v81_v31 = vadd.f32 %v80_v30, %v79_v29 }
 0x1de   :  { %v82_v32 = vrot.slane %v81_v31, 2 }
 0x1e0   :  { %v83_v33 = vadd.f32 %v82_v32, %v81_v31 }
 0x1e2   :  { %v84_v34 = vrot.slane %v83_v33, 1 }
 0x1e4   :  { %v85_v35 = vadd.f32 %v84_v34, %v83_v33 }
 0x1e6   :  { %104 = vpush %v85_v35 }
 0x217   :  { %s105_s0 = spop %104 }
 0x218   :  { %88 = sst [smem:[#allocation7]] %s105_s0 }
 0x219   :  { %96 = dma.smem_to_hbm %s177_s1, 16, %s204_s2, [#allocation4]  }
 0x21a   :  { %171 = dma.done.wait [#allocation4], 16  }
 0x21b   :  { %172 = vsyncadd [#allocation4], 4294967280 }
 0x21c   :  { %100 = sfence }
 0x21d   :  { %101 = vsyncpa [#allocation3], 1 }
 0x21e   :  { %102 = vsyncpa [#allocation6], 1 }
 0x21f   :  { %103 = vsyncpa [#allocation4], 1 }

</bundles_post_ra>
